<compile_context>
chip_gen: v6e
topology: v6e:2x2x1
jax: 0.10.0
libtpu: 0.0.40
codegen_flags: <defaults>
</compile_context>

<pallas_src>
import jax
import jax.numpy as jnp
from jax.experimental import pallas as pl
from jax.experimental.pallas import tpu as pltpu

LANE = 128


def _add_noise_kernel(a_ref, s_ref, x_ref, n_ref, o_ref):
    # a_ref, s_ref : (B, 1)  per-sample coefficients (broadcast over features)
    # x_ref, n_ref : (B, TN) lane-dense feature blocks
    # o_ref        : (B, TN)
    o_ref[...] = a_ref[...] * x_ref[...] + s_ref[...] * n_ref[...]


def make_addnoise_buffers(T: int = 1000, start: float = 1e-4, end: float = 0.02):
    """Equivalent of the registered buffers in the PyTorch module."""
    betas = jnp.linspace(start, end, T, dtype=jnp.float32)
    alphas = 1.0 - betas
    alphas_bar = jnp.cumprod(alphas)
    return {
        "sqrt_alphas_bar": jnp.sqrt(alphas_bar),
        "sqrt_one_minus_alphas_bar": jnp.sqrt(1.0 - alphas_bar),
    }


def _choose_col_tile(B: int, n_pad: int) -> int:
    # Target <= ~2 MiB of f32 per input block; always a multiple of 128 that
    # divides the (padded) feature count.
    max_tn = max(LANE, (2 * 1024 * 1024 // (4 * max(B, 1))) // LANE * LANE)
    if n_pad <= max_tn:
        return n_pad
    tn = max_tn
    while n_pad % tn:          # terminates: n_pad is a multiple of LANE
        tn -= LANE
    return tn


def add_noise(x_0, t, key, buffers):
    """Forward pass of AddNoise. Returns (x_t, noise)."""
    orig_shape = x_0.shape
    B = orig_shape[0]
    N = 1
    for d in orig_shape[1:]:
        N *= d

    x_0 = x_0.astype(jnp.float32)
    noise = jax.random.normal(key, orig_shape, dtype=jnp.float32)

    # extract(): per-sample coefficients gathered from the (T,) tables,
    # broadcast over all non-batch dims inside the kernel via a (B, 1) block.
    a2 = jnp.take(buffers["sqrt_alphas_bar"], t, axis=0).astype(jnp.float32).reshape(B, 1)
    s2 = jnp.take(buffers["sqrt_one_minus_alphas_bar"], t, axis=0).astype(jnp.float32).reshape(B, 1)

    # Lane-dense 2D layout (B, N); pad the feature dim up to a multiple of 128
    # so all vector loads/stores are unmasked full-lane accesses.
    n_pad = ((N + LANE - 1) // LANE) * LANE
    x2 = x_0.reshape(B, N)
    n2 = noise.reshape(B, N)
    if n_pad != N:
        pad = ((0, 0), (0, n_pad - N))
        x2 = jnp.pad(x2, pad)
        n2 = jnp.pad(n2, pad)

    TN = _choose_col_tile(B, n_pad)
    grid = (n_pad // TN,)

    coef_spec = pl.BlockSpec((B, 1), lambda j: (0, 0))
    feat_spec = pl.BlockSpec((B, TN), lambda j: (0, j))

    x_t2 = pl.pallas_call(
        _add_noise_kernel,
        out_shape=jax.ShapeDtypeStruct((B, n_pad), jnp.float32),
        grid=grid,
        in_specs=[coef_spec, coef_spec, feat_spec, feat_spec],
        out_specs=feat_spec,
        compiler_params=pltpu.CompilerParams(
            dimension_semantics=("parallel",)),
    )(a2, s2, x2, n2)

    x_t = x_t2[:, :N].reshape(orig_shape)
    return x_t, noise


if __name__ == "__main__":
    B, C, H, W = 2, 4, 16, 16
    T = 1000

    key = jax.random.PRNGKey(0)
    kx, kt, kn = jax.random.split(key, 3)
    x_0 = jax.random.normal(kx, (B, C, H, W), dtype=jnp.float32)
    t = jax.random.randint(kt, (B,), 0, T, dtype=jnp.int32)

    buffers = make_addnoise_buffers(T=T, start=1e-4, end=0.02)

    x_t, noise = add_noise(x_0, t, kn, buffers)
    x_t = jax.block_until_ready(x_t)

    # Pure-JAX reference using the same noise the kernel consumed.
    a = buffers["sqrt_alphas_bar"][t].reshape(B, 1, 1, 1)
    s = buffers["sqrt_one_minus_alphas_bar"][t].reshape(B, 1, 1, 1)
    ref = a * x_0 + s * noise

    assert x_t.shape == (B, C, H, W)
    assert noise.shape == (B, C, H, W)
    max_err = float(jnp.max(jnp.abs(x_t - ref)))
    assert jnp.allclose(x_t, ref, atol=1e-5, rtol=1e-5), f"max_err={max_err}"
    print("KERNEL_OK")
</pallas_src>

<mosaic_0001>
module attributes {stable_mosaic.version = 11 : i64} {
  func.func @_add_noise_kernel(%arg0: i32, %arg1: memref<2x1xf32, #tpu.memory_space<vmem>>, %arg2: memref<2x1xf32, #tpu.memory_space<vmem>>, %arg3: memref<2x1024xf32, #tpu.memory_space<vmem>>, %arg4: memref<2x1024xf32, #tpu.memory_space<vmem>>, %arg5: memref<2x1024xf32, #tpu.memory_space<vmem>>) attributes {dimension_semantics = [#tpu.dimension_semantics<parallel>], iteration_bounds = array<i64: 1>, scalar_prefetch = 0 : i64, scratch_operands = 0 : i64, tpu.core_type = #tpu.core_type<tc>, window_params = [{pipeline_mode = #tpu.pipeline_mode<synchronous>, transform_indices = @transform_0, window_bounds = array<i64: 2, 1>}, {pipeline_mode = #tpu.pipeline_mode<synchronous>, transform_indices = @transform_1, window_bounds = array<i64: 2, 1>}, {transform_indices = @transform_2, window_bounds = array<i64: 2, 1024>}, {transform_indices = @transform_3, window_bounds = array<i64: 2, 1024>}, {transform_indices = @transform_4, window_bounds = array<i64: 2, 1024>}]} {
    %c0 = arith.constant 0 : index
    %c0_0 = arith.constant 0 : index
    %0 = vector.load %arg1[%c0, %c0_0] : memref<2x1xf32, #tpu.memory_space<vmem>>, vector<2x1xf32>
    %c0_1 = arith.constant 0 : index
    %c0_2 = arith.constant 0 : index
    %1 = vector.load %arg3[%c0_1, %c0_2] : memref<2x1024xf32, #tpu.memory_space<vmem>>, vector<2x1024xf32>
    %2 = vector.broadcast %0 : vector<2x1xf32> to vector<2x1024xf32>
    %3 = arith.mulf %2, %1 : vector<2x1024xf32>
    %c0_3 = arith.constant 0 : index
    %c0_4 = arith.constant 0 : index
    %4 = vector.load %arg2[%c0_3, %c0_4] : memref<2x1xf32, #tpu.memory_space<vmem>>, vector<2x1xf32>
    %c0_5 = arith.constant 0 : index
    %c0_6 = arith.constant 0 : index
    %5 = vector.load %arg4[%c0_5, %c0_6] : memref<2x1024xf32, #tpu.memory_space<vmem>>, vector<2x1024xf32>
    %6 = vector.broadcast %4 : vector<2x1xf32> to vector<2x1024xf32>
    %7 = arith.mulf %6, %5 : vector<2x1024xf32>
    %8 = arith.addf %3, %7 : vector<2x1024xf32>
    %c0_7 = arith.constant 0 : index
    %c0_8 = arith.constant 0 : index
    %9 = vector.load %arg5[%c0_7, %c0_8] : memref<2x1024xf32, #tpu.memory_space<vmem>>, vector<2x1024xf32>
    tpu.vector_store %arg5[%c0_7, %c0_8], %8 {strides = array<i32>} : memref<2x1024xf32, #tpu.memory_space<vmem>>, vector<2x1024xf32>,
    return
  }
  func.func @transform_0(%arg0: i32) -> (i32, i32) {
    %c0_i32 = arith.constant 0 : i32
    %c0_i32_0 = arith.constant 0 : i32
    %c0_i32_1 = arith.constant 0 : i32
    return %c0_i32, %c0_i32_0 : i32, i32
  }
  func.func @transform_1(%arg0: i32) -> (i32, i32) {
    %c0_i32 = arith.constant 0 : i32
    %c0_i32_0 = arith.constant 0 : i32
    %c0_i32_1 = arith.constant 0 : i32
    return %c0_i32, %c0_i32_0 : i32, i32
  }
  func.func @transform_2(%arg0: i32) -> (i32, i32) {
    %c0_i32 = arith.constant 0 : i32
    %c0_i32_0 = arith.constant 0 : i32
    return %c0_i32, %arg0 : i32, i32
  }
  func.func @transform_3(%arg0: i32) -> (i32, i32) {
    %c0_i32 = arith.constant 0 : i32
    %c0_i32_0 = arith.constant 0 : i32
    return %c0_i32, %arg0 : i32, i32
  }
  func.func @transform_4(%arg0: i32) -> (i32, i32) {
    %c0_i32 = arith.constant 0 : i32
    %c0_i32_0 = arith.constant 0 : i32
    return %c0_i32, %arg0 : i32, i32
  }
}

</mosaic_0001>

<bundles_post_ra>
// kernel: tpu_custom_call.1
= control target key start
LH: loop header
LB: loop body
LE: loop exit
PB: predicated region body
PF: predicated region fallthrough
CT: control target
= control target key end

     0   :  { %9 = vsyncpa [#allocation3], 0  ;;  %s353_s0 = inlined_call_operand.vmem [shape: f32[2,1], index: 0, kind: input, shape index: {}]   ;;  %s354_s1 = inlined_call_operand.vmem [shape: f32[2,1], index: 1, kind: input, shape index: {}]   ;;  %s355_s2 = inlined_call_operand.hbm [shape: f32[2,1024], index: 2, kind: input, shape index: {}]   ;;  %s356_s3 = inlined_call_operand.hbm [shape: f32[2,1024], index: 3, kind: input, shape index: {}]   ;;  %s357_s4 = inlined_call_operand.hbm [shape: f32[2,1024], index: 4, kind: output, shape index: {}]  }
   0x1   :  { %10 = vsyncpa [#allocation6], 0 }
   0x2   :  { %11 = vsyncpa [#allocation4], 0  ;;  %s308_s15 = smov [#allocation2]   ;;  %s309_s17 = smov [#allocation5]  }
   0x3   :  { %s22_s16 = sshll.u32 %s308_s15, 4  ;;  %s32_s18 = sshll.u32 %s309_s17, 4  ;;  %s23_s16 = int_to_ptr.vmem [resolvable:$true] %s22_s16  ;;  %s33_s18 = int_to_ptr.vmem [resolvable:$true] %s32_s18 }
   0x4   :  { %s250_s19 = scalar_lea.vmem %s23_s16, 256  ;;  %p255_p1 = scmp.lt.s32.totalorder %s23_s16, %s23_s16 }
   0x5   :  { %p251_p0 = scmp.ne.s32.totalorder %s23_s16, %s250_s19  ;;  %p256_p2 = scmp.lt.s32.totalorder %s250_s19, %s250_s19 }
   0x7   :  { %p257_p3 = por %p256_p2, %p255_p1 }
   0x9   :  { %p258_p4 = pnand %p257_p3, %p251_p0 }
   0xb   :  { %261 = shalt.err (!%p258_p4)
}
   0xc   :  { %25 = dma.hbm_to_vmem [thread:$0]  %s355_s2, 256, %s23_s16, [#allocation3]  }
   0xd   :  { %s270_s22 = scalar_lea.vmem %s33_s18, 256  ;;  %p275_p6 = scmp.lt.s32.totalorder %s33_s18, %s33_s18 }
   0xe   :  { %p271_p5 = scmp.ne.s32.totalorder %s33_s18, %s270_s22  ;;  %p276_p7 = scmp.lt.s32.totalorder %s270_s22, %s270_s22 }
  0x10   :  { %p277_p8 = por %p276_p7, %p275_p6 }
  0x12   :  { %p278_p9 = pnand %p277_p8, %p271_p5 }
  0x14   :  { %281 = shalt.err (!%p278_p9)
}
  0x15   :  { %35 = dma.hbm_to_vmem [thread:$0]  %s356_s3, 256, %s33_s18, [#allocation6]  }
  0x16   :  { %302 = dma.done.wait [#allocation3], 256  }
  0x17   :  { %303 = vsyncadd [#allocation3], 4294967040 }
  0x18   :  { %304 = dma.done.wait [#allocation6], 256  }
  0x19   :  { %305 = vsyncadd [#allocation6], 4294967040  ;;  %v310_v0 = vmov 0   ;;  %v42_v1 = vld [vmem:[%s353_s0] sm:$0x3]  ;;  %v56_v5 = vlaneseq  ;;  %v44_v9 = vld [vmem:[#allocation2 + $0x8] sm:$0xff] }
  0x1a   :  { %237 = vset.pattern.permute.xlu0 %v310_v0  ;;  %v102_v2 = vld [vmem:[%s354_s1] sm:$0x3]  ;;  %v311_v3 = vmov 1983009808   ;;  %v103_v10 = vld [vmem:[#allocation5] sm:$0xff]  ;;  %v104_v13 = vld [vmem:[#allocation5 + $0x8] sm:$0xff]  ;;  %v69_v14 = vcombine.high %v44_v9, %v44_v9 }
  0x1b   :  { %47 = vperm.xlu0 %237, %v42_v1   ;;  %v54_v4 = vunpack.c.l.s4 %v311_v3  ;;  %v57_v7 = vshrl.u32 %v56_v5, 7  ;;  %v43_v8 = vld [vmem:[#allocation2] sm:$0xff]  ;;  %v112_v15 = vcombine.high %v103_v10, %v103_v10  ;;  %v129_v16 = vcombine.high %v104_v13, %v104_v13  ;;  %s312_s0 = smov [#allocation7]  }
  0x1c   :  { %v52_v11 = vcombine.high %v43_v8, %v43_v8  ;;  %s222_s1 = sshll.u32 %s312_s0, 4  ;;  %s223_s1 = int_to_ptr.vmem [resolvable:$true] %s222_s1 }
  0x1d   :  { %v55_v6 = vunpack.c.0.s8 %v54_v4  ;;  %s282_s3 = scalar_lea.vmem %s223_s1, 256  ;;  %p287_p11 = scmp.lt.s32.totalorder %s223_s1, %s223_s1 }
  0x1e   :  { %p283_p10 = scmp.ne.s32.totalorder %s223_s1, %s282_s3  ;;  %p288_p12 = scmp.lt.s32.totalorder %s282_s3, %s282_s3 }
  0x1f   :  { %107 = vperm.xlu0 %237, %v102_v2   ;;  %v58_v12 = vsub.s32 %v55_v6, %v57_v7 }
  0x20   :  { %p289_p13 = por %p288_p12, %p287_p11 }
  0x21   :  { %v59_v17 = vrot.slane %v43_v8, %v58_v12  ;;  %v66_v18 = vrot.slane %v52_v11, %v58_v12  ;;  %v76_v19 = vrot.slane %v44_v9, %v58_v12  ;;  %v83_v20 = vrot.slane %v69_v14, %v58_v12 }
  0x22   :  { %v119_v21 = vrot.slane %v103_v10, %v58_v12  ;;  %v126_v22 = vrot.slane %v112_v15, %v58_v12  ;;  %v136_v23 = vrot.slane %v104_v13, %v58_v12  ;;  %v143_v24 = vrot.slane %v129_v16, %v58_v12  ;;  %p290_p0 = pnand %p289_p13, %p283_p10 }
  0x23   :  { %v67_v25 = vcombine.high %v59_v17, %v59_v17  ;;  %v68_v26 = vcombine.high %v66_v18, %v66_v18  ;;  %v84_v28 = vcombine.high %v76_v19, %v76_v19  ;;  %v85_v29 = vcombine.high %v83_v20, %v83_v20 }
  0x24   :  { %v127_v30 = vcombine.high %v119_v21, %v119_v21  ;;  %v128_v31 = vcombine.high %v126_v22, %v126_v22  ;;  %v144_v32 = vcombine.high %v136_v23, %v136_v23  ;;  %v145_v33 = vcombine.high %v143_v24, %v143_v24 }
  0x96   :  { %v48_v27 = vpop.permute.xlu0 %47 }
  0x97   :  { %v94_v34 = vmul.f32 %v59_v17, %v48_v27  ;;  %v95_v35 = vmul.f32 %v67_v25, %v48_v27  ;;  %v96_v36 = vmul.f32 %v66_v18, %v48_v27  ;;  %v97_v37 = vmul.f32 %v68_v26, %v48_v27 }
  0x98   :  { %v98_v39 = vmul.f32 %v76_v19, %v48_v27  ;;  %v99_v40 = vmul.f32 %v84_v28, %v48_v27  ;;  %v100_v41 = vmul.f32 %v83_v20, %v48_v27  ;;  %v101_v42 = vmul.f32 %v85_v29, %v48_v27 }
  0x9a   :  { %v108_v38 = vpop.permute.xlu0 %107 }
  0x9b   :  { %v154_v43 = vmul.f32 %v119_v21, %v108_v38  ;;  %v155_v44 = vmul.f32 %v127_v30, %v108_v38  ;;  %v156_v45 = vmul.f32 %v126_v22, %v108_v38  ;;  %v157_v46 = vmul.f32 %v128_v31, %v108_v38 }
  0x9c   :  { %v158_v47 = vmul.f32 %v136_v23, %v108_v38  ;;  %v159_v48 = vmul.f32 %v144_v32, %v108_v38  ;;  %v160_v49 = vmul.f32 %v143_v24, %v108_v38  ;;  %v161_v50 = vmul.f32 %v145_v33, %v108_v38 }
  0x9d   :  { %v162_v51 = vadd.f32 %v154_v43, %v94_v34  ;;  %v163_v52 = vadd.f32 %v155_v44, %v95_v35  ;;  %v164_v53 = vadd.f32 %v156_v45, %v96_v36  ;;  %v165_v54 = vadd.f32 %v157_v46, %v97_v37 }
  0x9e   :  { %v166_v55 = vadd.f32 %v158_v47, %v98_v39  ;;  %v167_v56 = vadd.f32 %v159_v48, %v99_v40  ;;  %v168_v57 = vadd.f32 %v160_v49, %v100_v41  ;;  %v169_v58 = vadd.f32 %v161_v50, %v101_v42 }
  0x9f   :  { %v178_v59 = vcombine.low %v162_v51, %v163_v52  ;;  %v179_v60 = vcombine.low %v164_v53, %v165_v54 }
  0xa0   :  { %v195_v61 = vcombine.low %v166_v55, %v167_v56  ;;  %v196_v62 = vcombine.low %v168_v57, %v169_v58 }
  0xa1   :  { %v186_v63 = vrot.slane %v178_v59, %v58_v12  ;;  %v193_v0 = vrot.slane %v179_v60, %v58_v12 }
  0xa2   :  { %v203_v1 = vrot.slane %v195_v61, %v58_v12  ;;  %v210_v2 = vrot.slane %v196_v62, %v58_v12 }
  0xa3   :  { %v194_v3 = vcombine.low %v186_v63, %v193_v0 }
  0xa4   :  { %v211_v4 = vcombine.low %v203_v1, %v210_v2 }
  0xa5   :  { %214 = vst [vmem:[#allocation7] sm:$0xff] %v194_v3 }
  0xa6   :  { %215 = vst [vmem:[#allocation7 + $0x8] sm:$0xff] %v211_v4 }
  0xa7   :  { %293 = shalt.err (!%p290_p0)
}
  0xa8   :  { %225 = dma.vmem_to_hbm [thread:$0]  %s223_s1, 256, %s357_s4, [#allocation4]  }
  0xa9   :  { %306 = dma.done.wait [#allocation4], 256  }
  0xaa   :  { %307 = vsyncadd [#allocation4], 4294967040 }
  0xab   :  { %229 = vsyncpa [#allocation3], 1 }
  0xac   :  { %230 = vsyncpa [#allocation6], 1 }
  0xad   :  { %231 = vsyncpa [#allocation4], 1 }

</bundles_post_ra>
